<compile_context>
chip_gen: v6e
topology: v6e:2x2x1
jax: 0.10.0
libtpu: 0.0.40
codegen_flags: <defaults>
</compile_context>

<pallas_src>
import functools

import jax
import jax.numpy as jnp
from jax import lax
from jax.experimental import pallas as pl
from jax.experimental.pallas import tpu as pltpu


# ----------------------------------------------------------------------------
# Fused Pallas kernel: the entire DeepGAT stack on a dense-adjacency graph.
# ----------------------------------------------------------------------------
def deep_gat_kernel(*refs, layer_cfgs):
    """refs = (adj, h0, [w_aug, wl_t, bias] * L, out)."""
    adj_ref = refs[0]
    h_ref = refs[1]
    out_ref = refs[-1]
    prm = refs[2:-1]

    # Adjacency mask: decoded ONCE, reused by every layer and every head.
    adj_mask = adj_ref[...] > 0            # (N_dst, N_src) bool
    neg_inf = jnp.float32(-1e30)

    h = h_ref[...].astype(jnp.float32)     # (N, Fin) current node features

    for li, (num_heads, out_dim, apply_relu) in enumerate(layer_cfgs):
        w_aug = prm[3 * li][...]           # (Fin, H*D + H) bf16 = [W | W.attn_r]
        wl_t = prm[3 * li + 1][...]        # (H, Fin)       bf16 = (W.attn_l)^T
        bias = prm[3 * li + 2][...]        # (1, H*D)       f32

        hd_total = num_heads * out_dim
        h_b = h.astype(jnp.bfloat16)       # MXU operand in bf16, f32 accum

        # One MXU matmul yields both the projected features z and the
        # destination attention scores er (attn_r folded into the weights).
        zaug = jnp.dot(h_b, w_aug, preferred_element_type=jnp.float32)
        z = zaug[:, :hd_total]                             # (N, H*D)
        er = zaug[:, hd_total:hd_total + num_heads]        # (N, H)  dst scores

        # Source scores directly in lane (row) orientation: (H, N_src).
        # q@k^T-style contraction on the last dims -> MXU, no XLU transpose.
        el_t = lax.dot_general(
            wl_t, h_b,
            dimension_numbers=(((1,), (1,)), ((), ())),
            preferred_element_type=jnp.float32)            # (H, N)

        outs = []
        for hd in range(num_heads):        # static, unrolled over heads
            # NOTE: per-head slice of z is not 128-lane aligned at toy widths;
            # at production widths pick D a multiple of 128.
            zh = z[:, hd * out_dim:(hd + 1) * out_dim]     # (N, D)

            # e[dst, src] = leaky_relu(el[src] + er[dst]), slope 0.2.
            e = er[:, hd:hd + 1] + el_t[hd:hd + 1, :]      # (N_dst, N_src)
            e = jnp.where(e > 0, e, 0.2 * e)

            # Masked edge softmax over incoming edges (src axis).
            e = jnp.where(adj_mask, e, neg_inf)
            m = jnp.max(e, axis=1, keepdims=True)
            p = jnp.where(adj_mask, jnp.exp(e - m), 0.0)
            s = jnp.sum(p, axis=1, keepdims=True)
            # Zero in-degree nodes get all-zero output (DGL would raise unless
            # allow_zero_in_degree=True) -- intentional guard.
            inv = pl.reciprocal(jnp.where(s > 0, s, 1.0), approx=True)
            alpha = (p * inv).astype(jnp.bfloat16)

            # Aggregate neighbor features on the MXU: (N,N) @ (N,D).
            out_h = jnp.dot(alpha, zh.astype(jnp.bfloat16),
                            preferred_element_type=jnp.float32)
            outs.append(out_h)

        # Concatenate heads -> full H*D lane width, single add/relu per layer.
        out = outs[0] if num_heads == 1 else jnp.concatenate(outs, axis=1)
        out = out + bias
        if apply_relu:
            out = jnp.maximum(out, 0.0)
        h = out                            # feeds next layer, stays in VMEM

    out_ref[...] = h.astype(out_ref.dtype)  # single lane-dense store


# ----------------------------------------------------------------------------
# Host-side parameter preparation (attention folding + bf16 casts).
# ----------------------------------------------------------------------------
def _prepare_layer_params(p):
    w = p["w"]                                    # (Fin, H*D) f32
    num_heads, out_dim = p["num_heads"], p["out_dim"]
    fin = w.shape[0]
    w3 = w.reshape(fin, num_heads, out_dim)
    # Fold attention vectors into the projection (rides for free on the MXU).
    wr = jnp.einsum("fhd,hd->fh", w3, p["attn_r"])        # (Fin, H)
    wl = jnp.einsum("fhd,hd->fh", w3, p["attn_l"])        # (Fin, H)
    w_aug = jnp.concatenate([w, wr], axis=1).astype(jnp.bfloat16)
    wl_t = wl.T.astype(jnp.bfloat16)                      # (H, Fin)
    bias = p["bias"].astype(jnp.float32)                  # (1, H*D)
    return w_aug, wl_t, bias


def deep_gat_forward(layers, adj, h):
    n = h.shape[0]
    num_layers = len(layers)

    flat_params = []
    cfgs = []
    for i, p in enumerate(layers):
        w_aug, wl_t, bias = _prepare_layer_params(p)
        flat_params += [w_aug, wl_t, bias]
        # activation=F.relu on every layer except the last (matches module).
        cfgs.append((p["num_heads"], p["out_dim"], i != num_layers - 1))

    out_width = layers[-1]["num_heads"] * layers[-1]["out_dim"]
    kernel = functools.partial(deep_gat_kernel, layer_cfgs=tuple(cfgs))
    vmem = pl.BlockSpec(memory_space=pltpu.MemorySpace.VMEM)

    out = pl.pallas_call(
        kernel,
        out_shape=jax.ShapeDtypeStruct((n, out_width), jnp.float32),
        in_specs=[vmem] * (2 + len(flat_params)),
        out_specs=vmem,
        compiler_params=pltpu.CompilerParams(
            vmem_limit_bytes=32 * 1024 * 1024),
    )(adj.astype(jnp.bfloat16),            # bf16 adjacency: half the HBM bytes
      h.astype(jnp.float32),
      *flat_params)
    return out.reshape(n, -1)


# ----------------------------------------------------------------------------
# DeepGAT parameter construction (mirrors the PyTorch module's layer stack).
# ----------------------------------------------------------------------------
def init_gat_params(key, in_dim, out_dim, num_heads, scale=0.1):
    k1, k2, k3 = jax.random.split(key, 3)
    w = scale * jax.random.normal(k1, (in_dim, num_heads * out_dim),
                                  dtype=jnp.float32)
    attn_l = scale * jax.random.normal(k2, (num_heads, out_dim),
                                       dtype=jnp.float32)
    attn_r = scale * jax.random.normal(k3, (num_heads, out_dim),
                                       dtype=jnp.float32)
    bias = jnp.zeros((1, num_heads * out_dim), dtype=jnp.float32)
    return dict(w=w, attn_l=attn_l, attn_r=attn_r, bias=bias,
                num_heads=num_heads, out_dim=out_dim)


def init_deep_gat(key, in_dim, hidden_dim, out_dim, num_heads,
                  num_hidden_layers=0):
    keys = jax.random.split(key, 2 + num_hidden_layers)
    layers = [init_gat_params(keys[0], in_dim, hidden_dim, num_heads)]
    for i in range(num_hidden_layers):
        layers.append(init_gat_params(keys[1 + i], hidden_dim * num_heads,
                                      hidden_dim, num_heads))
    layers.append(init_gat_params(keys[-1], hidden_dim * num_heads,
                                  out_dim, 1))
    return layers


# ----------------------------------------------------------------------------
# Main
# ----------------------------------------------------------------------------
if __name__ == "__main__":
    key = jax.random.PRNGKey(0)
    k_feat, k_param = jax.random.split(key)

    # Small deterministic problem: 16 nodes, ring graph with self loops.
    N = 16
    in_dim, hidden_dim, out_dim, num_heads, num_hidden = 8, 8, 4, 2, 1

    h = jax.random.normal(k_feat, (N, in_dim), dtype=jnp.float32)

    idx = jnp.arange(N)
    adj = jnp.eye(N, dtype=jnp.float32)                      # self loops
    adj = adj.at[(idx + 1) % N, idx].set(1.0)                # edge i -> i+1
    adj = adj.at[(idx - 1) % N, idx].set(1.0)                # edge i -> i-1

    layers = init_deep_gat(k_param, in_dim, hidden_dim, out_dim, num_heads,
                           num_hidden_layers=num_hidden)

    out = deep_gat_forward(layers, adj, h)
    jax.block_until_ready(out)
    assert out.shape == (N, out_dim), out.shape
    print("KERNEL_OK")
</pallas_src>

<mosaic_0001>
module attributes {stable_mosaic.version = 11 : i64} {
  func.func @deep_gat_kernel(%arg0: memref<16x16xbf16, #tpu.memory_space<vmem>>, %arg1: memref<16x8xf32, #tpu.memory_space<vmem>>, %arg2: memref<8x18xbf16, #tpu.memory_space<vmem>>, %arg3: memref<2x8xbf16, #tpu.memory_space<vmem>>, %arg4: memref<1x16xf32, #tpu.memory_space<vmem>>, %arg5: memref<16x18xbf16, #tpu.memory_space<vmem>>, %arg6: memref<2x16xbf16, #tpu.memory_space<vmem>>, %arg7: memref<1x16xf32, #tpu.memory_space<vmem>>, %arg8: memref<16x5xbf16, #tpu.memory_space<vmem>>, %arg9: memref<1x16xbf16, #tpu.memory_space<vmem>>, %arg10: memref<1x4xf32, #tpu.memory_space<vmem>>, %arg11: memref<16x4xf32, #tpu.memory_space<vmem>>) attributes {dimension_semantics = [], scalar_prefetch = 0 : i64, scratch_operands = 0 : i64, tpu.core_type = #tpu.core_type<tc>} {
    %c0 = arith.constant 0 : index
    %c0_0 = arith.constant 0 : index
    %0 = vector.load %arg0[%c0, %c0_0] : memref<16x16xbf16, #tpu.memory_space<vmem>>, vector<16x16xbf16>
    %cst = arith.constant 0.000000e+00 : bf16
    %1 = vector.broadcast %cst : bf16 to vector<16x16xbf16>
    %2 = arith.cmpf ogt, %0, %1 : vector<16x16xbf16>
    %c0_1 = arith.constant 0 : index
    %c0_2 = arith.constant 0 : index
    %3 = vector.load %arg1[%c0_1, %c0_2] : memref<16x8xf32, #tpu.memory_space<vmem>>, vector<16x8xf32>
    %c0_3 = arith.constant 0 : index
    %c0_4 = arith.constant 0 : index
    %4 = vector.load %arg2[%c0_3, %c0_4] : memref<8x18xbf16, #tpu.memory_space<vmem>>, vector<8x18xbf16>
    %c0_5 = arith.constant 0 : index
    %c0_6 = arith.constant 0 : index
    %5 = vector.load %arg3[%c0_5, %c0_6] : memref<2x8xbf16, #tpu.memory_space<vmem>>, vector<2x8xbf16>
    %c0_7 = arith.constant 0 : index
    %c0_8 = arith.constant 0 : index
    %6 = vector.load %arg4[%c0_7, %c0_8] : memref<1x16xf32, #tpu.memory_space<vmem>>, vector<1x16xf32>
    %7 = arith.truncf %3 : vector<16x8xf32> to vector<16x8xbf16>
    %cst_9 = arith.constant dense<0.000000e+00> : vector<16x18xf32>
    %8 = tpu.matmul %7, %4, %cst_9 {dimension_numbers = #tpu.dot_dimension_numbers<[1], [0], [0], [1], [0, 0, 1, 1], [], []>} : vector<16x8xbf16>, vector<8x18xbf16>, vector<16x18xf32> -> vector<16x18xf32>
    %9 = vector.extract_strided_slice %8 {offsets = [0, 0], sizes = [16, 16], strides = [1, 1]} : vector<16x18xf32> to vector<16x16xf32>
    %10 = vector.extract_strided_slice %8 {offsets = [0, 16], sizes = [16, 2], strides = [1, 1]} : vector<16x18xf32> to vector<16x2xf32>
    %cst_10 = arith.constant dense<0.000000e+00> : vector<2x16xf32>
    %11 = tpu.matmul %5, %7, %cst_10 {dimension_numbers = #tpu.dot_dimension_numbers<[1], [1], [0], [0], [0, 0, 1, 0], [], []>} : vector<2x8xbf16>, vector<16x8xbf16>, vector<2x16xf32> -> vector<2x16xf32>
    %12 = vector.extract_strided_slice %9 {offsets = [0, 0], sizes = [16, 8], strides = [1, 1]} : vector<16x16xf32> to vector<16x8xf32>
    %13 = vector.extract_strided_slice %10 {offsets = [0, 0], sizes = [16, 1], strides = [1, 1]} : vector<16x2xf32> to vector<16x1xf32>
    %14 = vector.extract_strided_slice %11 {offsets = [0, 0], sizes = [1, 16], strides = [1, 1]} : vector<2x16xf32> to vector<1x16xf32>
    %15 = vector.broadcast %13 : vector<16x1xf32> to vector<16x16xf32>
    %16 = vector.broadcast %14 : vector<1x16xf32> to vector<16x16xf32>
    %17 = arith.addf %15, %16 : vector<16x16xf32>
    %cst_11 = arith.constant 0.000000e+00 : f32
    %18 = vector.broadcast %cst_11 : f32 to vector<16x16xf32>
    %19 = arith.cmpf ogt, %17, %18 : vector<16x16xf32>
    %cst_12 = arith.constant 2.000000e-01 : f32
    %20 = vector.broadcast %cst_12 : f32 to vector<16x16xf32>
    %21 = arith.mulf %20, %17 : vector<16x16xf32>
    %22 = arith.select %19, %17, %21 : vector<16x16xi1>, vector<16x16xf32>
    %cst_13 = arith.constant -1.000000e+30 : f32
    %23 = vector.broadcast %cst_13 : f32 to vector<16x16xf32>
    %24 = arith.select %2, %22, %23 : vector<16x16xi1>, vector<16x16xf32>
    %cst_14 = arith.constant dense<0xFF800000> : vector<16xf32>
    %25 = vector.multi_reduction <maximumf>, %24, %cst_14 [1] : vector<16x16xf32> to vector<16xf32>
    %26 = vector.shape_cast %25 : vector<16xf32> to vector<16x1xf32>
    %27 = vector.broadcast %26 : vector<16x1xf32> to vector<16x16xf32>
    %28 = arith.subf %24, %27 : vector<16x16xf32>
    %29 = math.exp %28 : vector<16x16xf32>
    %cst_15 = arith.constant 0.000000e+00 : f32
    %30 = vector.broadcast %cst_15 : f32 to vector<16x16xf32>
    %31 = arith.select %2, %29, %30 : vector<16x16xi1>, vector<16x16xf32>
    %cst_16 = arith.constant dense<0.000000e+00> : vector<16xf32>
    %32 = vector.multi_reduction <add>, %31, %cst_16 [1] : vector<16x16xf32> to vector<16xf32>
    %33 = vector.shape_cast %32 : vector<16xf32> to vector<16x1xf32>
    %cst_17 = arith.constant 0.000000e+00 : f32
    %34 = vector.broadcast %cst_17 : f32 to vector<16x1xf32>
    %35 = arith.cmpf ogt, %33, %34 : vector<16x1xf32>
    %cst_18 = arith.constant 1.000000e+00 : f32
    %36 = vector.broadcast %cst_18 : f32 to vector<16x1xf32>
    %37 = arith.select %35, %33, %36 : vector<16x1xi1>, vector<16x1xf32>
    %38 = tpu.reciprocal %37 {approx = true} : vector<16x1xf32> -> vector<16x1xf32>
    %39 = vector.broadcast %38 : vector<16x1xf32> to vector<16x16xf32>
    %40 = arith.mulf %31, %39 : vector<16x16xf32>
    %41 = arith.truncf %40 : vector<16x16xf32> to vector<16x16xbf16>
    %42 = arith.truncf %12 : vector<16x8xf32> to vector<16x8xbf16>
    %cst_19 = arith.constant dense<0.000000e+00> : vector<16x8xf32>
    %43 = tpu.matmul %41, %42, %cst_19 {dimension_numbers = #tpu.dot_dimension_numbers<[1], [0], [0], [1], [0, 0, 1, 1], [], []>} : vector<16x16xbf16>, vector<16x8xbf16>, vector<16x8xf32> -> vector<16x8xf32>
    %44 = vector.extract_strided_slice %9 {offsets = [0, 8], sizes = [16, 8], strides = [1, 1]} : vector<16x16xf32> to vector<16x8xf32>
    %45 = vector.extract_strided_slice %10 {offsets = [0, 1], sizes = [16, 1], strides = [1, 1]} : vector<16x2xf32> to vector<16x1xf32>
    %46 = vector.extract_strided_slice %11 {offsets = [1, 0], sizes = [1, 16], strides = [1, 1]} : vector<2x16xf32> to vector<1x16xf32>
    %47 = vector.broadcast %45 : vector<16x1xf32> to vector<16x16xf32>
    %48 = vector.broadcast %46 : vector<1x16xf32> to vector<16x16xf32>
    %49 = arith.addf %47, %48 : vector<16x16xf32>
    %cst_20 = arith.constant 0.000000e+00 : f32
    %50 = vector.broadcast %cst_20 : f32 to vector<16x16xf32>
    %51 = arith.cmpf ogt, %49, %50 : vector<16x16xf32>
    %cst_21 = arith.constant 2.000000e-01 : f32
    %52 = vector.broadcast %cst_21 : f32 to vector<16x16xf32>
    %53 = arith.mulf %52, %49 : vector<16x16xf32>
    %54 = arith.select %51, %49, %53 : vector<16x16xi1>, vector<16x16xf32>
    %cst_22 = arith.constant -1.000000e+30 : f32
    %55 = vector.broadcast %cst_22 : f32 to vector<16x16xf32>
    %56 = arith.select %2, %54, %55 : vector<16x16xi1>, vector<16x16xf32>
    %cst_23 = arith.constant dense<0xFF800000> : vector<16xf32>
    %57 = vector.multi_reduction <maximumf>, %56, %cst_23 [1] : vector<16x16xf32> to vector<16xf32>
    %58 = vector.shape_cast %57 : vector<16xf32> to vector<16x1xf32>
    %59 = vector.broadcast %58 : vector<16x1xf32> to vector<16x16xf32>
    %60 = arith.subf %56, %59 : vector<16x16xf32>
    %61 = math.exp %60 : vector<16x16xf32>
    %cst_24 = arith.constant 0.000000e+00 : f32
    %62 = vector.broadcast %cst_24 : f32 to vector<16x16xf32>
    %63 = arith.select %2, %61, %62 : vector<16x16xi1>, vector<16x16xf32>
    %cst_25 = arith.constant dense<0.000000e+00> : vector<16xf32>
    %64 = vector.multi_reduction <add>, %63, %cst_25 [1] : vector<16x16xf32> to vector<16xf32>
    %65 = vector.shape_cast %64 : vector<16xf32> to vector<16x1xf32>
    %cst_26 = arith.constant 0.000000e+00 : f32
    %66 = vector.broadcast %cst_26 : f32 to vector<16x1xf32>
    %67 = arith.cmpf ogt, %65, %66 : vector<16x1xf32>
    %cst_27 = arith.constant 1.000000e+00 : f32
    %68 = vector.broadcast %cst_27 : f32 to vector<16x1xf32>
    %69 = arith.select %67, %65, %68 : vector<16x1xi1>, vector<16x1xf32>
    %70 = tpu.reciprocal %69 {approx = true} : vector<16x1xf32> -> vector<16x1xf32>
    %71 = vector.broadcast %70 : vector<16x1xf32> to vector<16x16xf32>
    %72 = arith.mulf %63, %71 : vector<16x16xf32>
    %73 = arith.truncf %72 : vector<16x16xf32> to vector<16x16xbf16>
    %74 = arith.truncf %44 : vector<16x8xf32> to vector<16x8xbf16>
    %cst_28 = arith.constant dense<0.000000e+00> : vector<16x8xf32>
    %75 = tpu.matmul %73, %74, %cst_28 {dimension_numbers = #tpu.dot_dimension_numbers<[1], [0], [0], [1], [0, 0, 1, 1], [], []>} : vector<16x16xbf16>, vector<16x8xbf16>, vector<16x8xf32> -> vector<16x8xf32>
    %76 = tpu.concatenate %43, %75 in 1 : vector<16x8xf32>, vector<16x8xf32> -> vector<16x16xf32>
    %77 = vector.broadcast %6 : vector<1x16xf32> to vector<16x16xf32>
    %78 = arith.addf %76, %77 : vector<16x16xf32>
    %cst_29 = arith.constant 0.000000e+00 : f32
    %79 = vector.broadcast %cst_29 : f32 to vector<16x16xf32>
    %80 = arith.maximumf %78, %79 : vector<16x16xf32>
    %c0_30 = arith.constant 0 : index
    %c0_31 = arith.constant 0 : index
    %81 = vector.load %arg5[%c0_30, %c0_31] : memref<16x18xbf16, #tpu.memory_space<vmem>>, vector<16x18xbf16>
    %c0_32 = arith.constant 0 : index
    %c0_33 = arith.constant 0 : index
    %82 = vector.load %arg6[%c0_32, %c0_33] : memref<2x16xbf16, #tpu.memory_space<vmem>>, vector<2x16xbf16>
    %c0_34 = arith.constant 0 : index
    %c0_35 = arith.constant 0 : index
    %83 = vector.load %arg7[%c0_34, %c0_35] : memref<1x16xf32, #tpu.memory_space<vmem>>, vector<1x16xf32>
    %84 = arith.truncf %80 : vector<16x16xf32> to vector<16x16xbf16>
    %cst_36 = arith.constant dense<0.000000e+00> : vector<16x18xf32>
    %85 = tpu.matmul %84, %81, %cst_36 {dimension_numbers = #tpu.dot_dimension_numbers<[1], [0], [0], [1], [0, 0, 1, 1], [], []>} : vector<16x16xbf16>, vector<16x18xbf16>, vector<16x18xf32> -> vector<16x18xf32>
    %86 = vector.extract_strided_slice %85 {offsets = [0, 0], sizes = [16, 16], strides = [1, 1]} : vector<16x18xf32> to vector<16x16xf32>
    %87 = vector.extract_strided_slice %85 {offsets = [0, 16], sizes = [16, 2], strides = [1, 1]} : vector<16x18xf32> to vector<16x2xf32>
    %cst_37 = arith.constant dense<0.000000e+00> : vector<2x16xf32>
    %88 = tpu.matmul %82, %84, %cst_37 {dimension_numbers = #tpu.dot_dimension_numbers<[1], [1], [0], [0], [0, 0, 1, 0], [], []>} : vector<2x16xbf16>, vector<16x16xbf16>, vector<2x16xf32> -> vector<2x16xf32>
    %89 = vector.extract_strided_slice %86 {offsets = [0, 0], sizes = [16, 8], strides = [1, 1]} : vector<16x16xf32> to vector<16x8xf32>
    %90 = vector.extract_strided_slice %87 {offsets = [0, 0], sizes = [16, 1], strides = [1, 1]} : vector<16x2xf32> to vector<16x1xf32>
    %91 = vector.extract_strided_slice %88 {offsets = [0, 0], sizes = [1, 16], strides = [1, 1]} : vector<2x16xf32> to vector<1x16xf32>
    %92 = vector.broadcast %90 : vector<16x1xf32> to vector<16x16xf32>
    %93 = vector.broadcast %91 : vector<1x16xf32> to vector<16x16xf32>
    %94 = arith.addf %92, %93 : vector<16x16xf32>
    %cst_38 = arith.constant 0.000000e+00 : f32
    %95 = vector.broadcast %cst_38 : f32 to vector<16x16xf32>
    %96 = arith.cmpf ogt, %94, %95 : vector<16x16xf32>
    %cst_39 = arith.constant 2.000000e-01 : f32
    %97 = vector.broadcast %cst_39 : f32 to vector<16x16xf32>
    %98 = arith.mulf %97, %94 : vector<16x16xf32>
    %99 = arith.select %96, %94, %98 : vector<16x16xi1>, vector<16x16xf32>
    %cst_40 = arith.constant -1.000000e+30 : f32
    %100 = vector.broadcast %cst_40 : f32 to vector<16x16xf32>
    %101 = arith.select %2, %99, %100 : vector<16x16xi1>, vector<16x16xf32>
    %cst_41 = arith.constant dense<0xFF800000> : vector<16xf32>
    %102 = vector.multi_reduction <maximumf>, %101, %cst_41 [1] : vector<16x16xf32> to vector<16xf32>
    %103 = vector.shape_cast %102 : vector<16xf32> to vector<16x1xf32>
    %104 = vector.broadcast %103 : vector<16x1xf32> to vector<16x16xf32>
    %105 = arith.subf %101, %104 : vector<16x16xf32>
    %106 = math.exp %105 : vector<16x16xf32>
    %cst_42 = arith.constant 0.000000e+00 : f32
    %107 = vector.broadcast %cst_42 : f32 to vector<16x16xf32>
    %108 = arith.select %2, %106, %107 : vector<16x16xi1>, vector<16x16xf32>
    %cst_43 = arith.constant dense<0.000000e+00> : vector<16xf32>
    %109 = vector.multi_reduction <add>, %108, %cst_43 [1] : vector<16x16xf32> to vector<16xf32>
    %110 = vector.shape_cast %109 : vector<16xf32> to vector<16x1xf32>
    %cst_44 = arith.constant 0.000000e+00 : f32
    %111 = vector.broadcast %cst_44 : f32 to vector<16x1xf32>
    %112 = arith.cmpf ogt, %110, %111 : vector<16x1xf32>
    %cst_45 = arith.constant 1.000000e+00 : f32
    %113 = vector.broadcast %cst_45 : f32 to vector<16x1xf32>
    %114 = arith.select %112, %110, %113 : vector<16x1xi1>, vector<16x1xf32>
    %115 = tpu.reciprocal %114 {approx = true} : vector<16x1xf32> -> vector<16x1xf32>
    %116 = vector.broadcast %115 : vector<16x1xf32> to vector<16x16xf32>
    %117 = arith.mulf %108, %116 : vector<16x16xf32>
    %118 = arith.truncf %117 : vector<16x16xf32> to vector<16x16xbf16>
    %119 = arith.truncf %89 : vector<16x8xf32> to vector<16x8xbf16>
    %cst_46 = arith.constant dense<0.000000e+00> : vector<16x8xf32>
    %120 = tpu.matmul %118, %119, %cst_46 {dimension_numbers = #tpu.dot_dimension_numbers<[1], [0], [0], [1], [0, 0, 1, 1], [], []>} : vector<16x16xbf16>, vector<16x8xbf16>, vector<16x8xf32> -> vector<16x8xf32>
    %121 = vector.extract_strided_slice %86 {offsets = [0, 8], sizes = [16, 8], strides = [1, 1]} : vector<16x16xf32> to vector<16x8xf32>
    %122 = vector.extract_strided_slice %87 {offsets = [0, 1], sizes = [16, 1], strides = [1, 1]} : vector<16x2xf32> to vector<16x1xf32>
    %123 = vector.extract_strided_slice %88 {offsets = [1, 0], sizes = [1, 16], strides = [1, 1]} : vector<2x16xf32> to vector<1x16xf32>
    %124 = vector.broadcast %122 : vector<16x1xf32> to vector<16x16xf32>
    %125 = vector.broadcast %123 : vector<1x16xf32> to vector<16x16xf32>
    %126 = arith.addf %124, %125 : vector<16x16xf32>
    %cst_47 = arith.constant 0.000000e+00 : f32
    %127 = vector.broadcast %cst_47 : f32 to vector<16x16xf32>
    %128 = arith.cmpf ogt, %126, %127 : vector<16x16xf32>
    %cst_48 = arith.constant 2.000000e-01 : f32
    %129 = vector.broadcast %cst_48 : f32 to vector<16x16xf32>
    %130 = arith.mulf %129, %126 : vector<16x16xf32>
    %131 = arith.select %128, %126, %130 : vector<16x16xi1>, vector<16x16xf32>
    %cst_49 = arith.constant -1.000000e+30 : f32
    %132 = vector.broadcast %cst_49 : f32 to vector<16x16xf32>
    %133 = arith.select %2, %131, %132 : vector<16x16xi1>, vector<16x16xf32>
    %cst_50 = arith.constant dense<0xFF800000> : vector<16xf32>
    %134 = vector.multi_reduction <maximumf>, %133, %cst_50 [1] : vector<16x16xf32> to vector<16xf32>
    %135 = vector.shape_cast %134 : vector<16xf32> to vector<16x1xf32>
    %136 = vector.broadcast %135 : vector<16x1xf32> to vector<16x16xf32>
    %137 = arith.subf %133, %136 : vector<16x16xf32>
    %138 = math.exp %137 : vector<16x16xf32>
    %cst_51 = arith.constant 0.000000e+00 : f32
    %139 = vector.broadcast %cst_51 : f32 to vector<16x16xf32>
    %140 = arith.select %2, %138, %139 : vector<16x16xi1>, vector<16x16xf32>
    %cst_52 = arith.constant dense<0.000000e+00> : vector<16xf32>
    %141 = vector.multi_reduction <add>, %140, %cst_52 [1] : vector<16x16xf32> to vector<16xf32>
    %142 = vector.shape_cast %141 : vector<16xf32> to vector<16x1xf32>
    %cst_53 = arith.constant 0.000000e+00 : f32
    %143 = vector.broadcast %cst_53 : f32 to vector<16x1xf32>
    %144 = arith.cmpf ogt, %142, %143 : vector<16x1xf32>
    %cst_54 = arith.constant 1.000000e+00 : f32
    %145 = vector.broadcast %cst_54 : f32 to vector<16x1xf32>
    %146 = arith.select %144, %142, %145 : vector<16x1xi1>, vector<16x1xf32>
    %147 = tpu.reciprocal %146 {approx = true} : vector<16x1xf32> -> vector<16x1xf32>
    %148 = vector.broadcast %147 : vector<16x1xf32> to vector<16x16xf32>
    %149 = arith.mulf %140, %148 : vector<16x16xf32>
    %150 = arith.truncf %149 : vector<16x16xf32> to vector<16x16xbf16>
    %151 = arith.truncf %121 : vector<16x8xf32> to vector<16x8xbf16>
    %cst_55 = arith.constant dense<0.000000e+00> : vector<16x8xf32>
    %152 = tpu.matmul %150, %151, %cst_55 {dimension_numbers = #tpu.dot_dimension_numbers<[1], [0], [0], [1], [0, 0, 1, 1], [], []>} : vector<16x16xbf16>, vector<16x8xbf16>, vector<16x8xf32> -> vector<16x8xf32>
    %153 = tpu.concatenate %120, %152 in 1 : vector<16x8xf32>, vector<16x8xf32> -> vector<16x16xf32>
    %154 = vector.broadcast %83 : vector<1x16xf32> to vector<16x16xf32>
    %155 = arith.addf %153, %154 : vector<16x16xf32>
    %cst_56 = arith.constant 0.000000e+00 : f32
    %156 = vector.broadcast %cst_56 : f32 to vector<16x16xf32>
    %157 = arith.maximumf %155, %156 : vector<16x16xf32>
    %c0_57 = arith.constant 0 : index
    %c0_58 = arith.constant 0 : index
    %158 = vector.load %arg8[%c0_57, %c0_58] : memref<16x5xbf16, #tpu.memory_space<vmem>>, vector<16x5xbf16>
    %c0_59 = arith.constant 0 : index
    %c0_60 = arith.constant 0 : index
    %159 = vector.load %arg9[%c0_59, %c0_60] : memref<1x16xbf16, #tpu.memory_space<vmem>>, vector<1x16xbf16>
    %c0_61 = arith.constant 0 : index
    %c0_62 = arith.constant 0 : index
    %160 = vector.load %arg10[%c0_61, %c0_62] : memref<1x4xf32, #tpu.memory_space<vmem>>, vector<1x4xf32>
    %161 = arith.truncf %157 : vector<16x16xf32> to vector<16x16xbf16>
    %cst_63 = arith.constant dense<0.000000e+00> : vector<16x5xf32>
    %162 = tpu.matmul %161, %158, %cst_63 {dimension_numbers = #tpu.dot_dimension_numbers<[1], [0], [0], [1], [0, 0, 1, 1], [], []>} : vector<16x16xbf16>, vector<16x5xbf16>, vector<16x5xf32> -> vector<16x5xf32>
    %163 = vector.extract_strided_slice %162 {offsets = [0, 0], sizes = [16, 4], strides = [1, 1]} : vector<16x5xf32> to vector<16x4xf32>
    %164 = vector.extract_strided_slice %162 {offsets = [0, 4], sizes = [16, 1], strides = [1, 1]} : vector<16x5xf32> to vector<16x1xf32>
    %cst_64 = arith.constant dense<0.000000e+00> : vector<1x16xf32>
    %165 = tpu.matmul %159, %161, %cst_64 {dimension_numbers = #tpu.dot_dimension_numbers<[1], [1], [0], [0], [0, 0, 1, 0], [], []>} : vector<1x16xbf16>, vector<16x16xbf16>, vector<1x16xf32> -> vector<1x16xf32>
    %166 = vector.broadcast %164 : vector<16x1xf32> to vector<16x16xf32>
    %167 = vector.broadcast %165 : vector<1x16xf32> to vector<16x16xf32>
    %168 = arith.addf %166, %167 : vector<16x16xf32>
    %cst_65 = arith.constant 0.000000e+00 : f32
    %169 = vector.broadcast %cst_65 : f32 to vector<16x16xf32>
    %170 = arith.cmpf ogt, %168, %169 : vector<16x16xf32>
    %cst_66 = arith.constant 2.000000e-01 : f32
    %171 = vector.broadcast %cst_66 : f32 to vector<16x16xf32>
    %172 = arith.mulf %171, %168 : vector<16x16xf32>
    %173 = arith.select %170, %168, %172 : vector<16x16xi1>, vector<16x16xf32>
    %cst_67 = arith.constant -1.000000e+30 : f32
    %174 = vector.broadcast %cst_67 : f32 to vector<16x16xf32>
    %175 = arith.select %2, %173, %174 : vector<16x16xi1>, vector<16x16xf32>
    %cst_68 = arith.constant dense<0xFF800000> : vector<16xf32>
    %176 = vector.multi_reduction <maximumf>, %175, %cst_68 [1] : vector<16x16xf32> to vector<16xf32>
    %177 = vector.shape_cast %176 : vector<16xf32> to vector<16x1xf32>
    %178 = vector.broadcast %177 : vector<16x1xf32> to vector<16x16xf32>
    %179 = arith.subf %175, %178 : vector<16x16xf32>
    %180 = math.exp %179 : vector<16x16xf32>
    %cst_69 = arith.constant 0.000000e+00 : f32
    %181 = vector.broadcast %cst_69 : f32 to vector<16x16xf32>
    %182 = arith.select %2, %180, %181 : vector<16x16xi1>, vector<16x16xf32>
    %cst_70 = arith.constant dense<0.000000e+00> : vector<16xf32>
    %183 = vector.multi_reduction <add>, %182, %cst_70 [1] : vector<16x16xf32> to vector<16xf32>
    %184 = vector.shape_cast %183 : vector<16xf32> to vector<16x1xf32>
    %cst_71 = arith.constant 0.000000e+00 : f32
    %185 = vector.broadcast %cst_71 : f32 to vector<16x1xf32>
    %186 = arith.cmpf ogt, %184, %185 : vector<16x1xf32>
    %cst_72 = arith.constant 1.000000e+00 : f32
    %187 = vector.broadcast %cst_72 : f32 to vector<16x1xf32>
    %188 = arith.select %186, %184, %187 : vector<16x1xi1>, vector<16x1xf32>
    %189 = tpu.reciprocal %188 {approx = true} : vector<16x1xf32> -> vector<16x1xf32>
    %190 = vector.broadcast %189 : vector<16x1xf32> to vector<16x16xf32>
    %191 = arith.mulf %182, %190 : vector<16x16xf32>
    %192 = arith.truncf %191 : vector<16x16xf32> to vector<16x16xbf16>
    %193 = arith.truncf %163 : vector<16x4xf32> to vector<16x4xbf16>
    %cst_73 = arith.constant dense<0.000000e+00> : vector<16x4xf32>
    %194 = tpu.matmul %192, %193, %cst_73 {dimension_numbers = #tpu.dot_dimension_numbers<[1], [0], [0], [1], [0, 0, 1, 1], [], []>} : vector<16x16xbf16>, vector<16x4xbf16>, vector<16x4xf32> -> vector<16x4xf32>
    %195 = vector.broadcast %160 : vector<1x4xf32> to vector<16x4xf32>
    %196 = arith.addf %194, %195 : vector<16x4xf32>
    %c0_74 = arith.constant 0 : index
    %c0_75 = arith.constant 0 : index
    %197 = vector.load %arg11[%c0_74, %c0_75] : memref<16x4xf32, #tpu.memory_space<vmem>>, vector<16x4xf32>
    tpu.vector_store %arg11[%c0_74, %c0_75], %196 {strides = array<i32>} : memref<16x4xf32, #tpu.memory_space<vmem>>, vector<16x4xf32>,
    return
  }
}

</mosaic_0001>

<bundles_post_ra>
// kernel: tpu_custom_call.1
= control target key start
LH: loop header
LB: loop body
LE: loop exit
PB: predicated region body
PF: predicated region fallthrough
CT: control target
= control target key end

     0   :  { %vm55_vm0 = vcmask 1043456   ;;  %v1052_v0 = vmov 0.0   ;;  %vm1053_vm1 = vmmov 0   ;;  %vm51_vm2 = vcmask 64512   ;;  %s1058_s28 = smov 8   ;;  %s1314_s2 = inlined_call_operand.vmem [shape: bf16[8,18], index: 2, kind: input, shape index: {}]   ;;  %s1315_s1 = inlined_call_operand.vmem [shape: f32[16,8], index: 1, kind: input, shape index: {}]   ;;  %s1316_s3 = inlined_call_operand.vmem [shape: bf16[2,8], index: 3, kind: input, shape index: {}]   ;;  %s1317_s0 = inlined_call_operand.vmem [shape: bf16[16,16], index: 0, kind: input, shape index: {}]   ;;  %s1318_s5 = inlined_call_operand.vmem [shape: bf16[16,18], index: 5, kind: input, shape index: {}]   ;;  %s1319_s4 = inlined_call_operand.vmem [shape: f32[1,16], index: 4, kind: input, shape index: {}]   ;;  %s1320_s6 = inlined_call_operand.vmem [shape: bf16[2,16], index: 6, kind: input, shape index: {}]   ;;  %s1321_s8 = inlined_call_operand.vmem [shape: bf16[16,5], index: 8, kind: input, shape index: {}]   ;;  %s1322_s7 = inlined_call_operand.vmem [shape: f32[1,16], index: 7, kind: input, shape index: {}]   ;;  %s1323_s9 = inlined_call_operand.vmem [shape: bf16[1,16], index: 9, kind: input, shape index: {}]   ;;  %s1324_s10 = inlined_call_operand.vmem [shape: f32[1,4], index: 10, kind: input, shape index: {}]   ;;  %s1325_s11 = inlined_call_operand.vmem [shape: f32[16,4], index: 11, kind: output, shape index: {}]  }
   0x1   :  { %929 = vmatprep.subr.bf16.mxu0 %v1052_v0  ;;  %v47_v1 = vld [vmem:[%s1314_s2] sm:$0xf]  ;;  %931 = vmatprep.mubr.msk.bf16.mxu0 %vm1053_vm1, %v1052_v0  ;;  %v46_v3 = vld [vmem:[%s1315_s1 + $0x8] sm:$0xff]  ;;  %v1054_v6 = vmov 17   ;;  %v1055_v8 = vmov 16   ;;  %v153_v19 = vlaneseq  ;;  %v1056_v25 = vmov 0  }
   0x2   :  { %v45_v2 = vld [vmem:[%s1315_s1] sm:$0xff]  ;;  %v57_v4 = vsel %vm55_vm0, %v47_v1, 0  ;;  %935 = vmatprep.subr.bf16.mxu1 %v1052_v0  ;;  %937 = vmatprep.mubr.msk.bf16.mxu1 %vm1053_vm1, %v1052_v0  ;;  %vm173_vm8 = vcmask 130048  }
   0x3   :  { %v50_v5 = vpack.c.bf16 %v46_v3, %v45_v2  ;;  %930 = vmatpush3.bf16.msra.mxu0 %v57_v4  ;;  %1003 = vset.pattern.permute.xlu0 %v1054_v6  ;;  %v48_v9 = vld [vmem:[%s1316_s3] sm:$0x1]  ;;  %v1153_v20 = vshrl.u32 %v153_v19, 7  ;;  %v42_v24 = vld [vmem:[%s1317_s0 + $0x4] sm:$0xf] }
   0x4   :  { %1004 = vset.pattern.permute.xlu1 %v1055_v8  ;;  %941 = vmatprep.subr.bf16.mxu0 %v1052_v0  ;;  %v41_v21 = vld [vmem:[%s1317_s0] sm:$0xf]  ;;  %vm44_vm4 = vcmp.gt.bf16.partialorder %v42_v24, 0  ;;  %s1057_s0 = smov 120  }
   0x5   :  { %v53_v7 = vsel %vm51_vm2, %v50_v5, 0  ;;  %vm43_vm3 = vcmp.gt.bf16.partialorder %v41_v21, 0  ;;  %v1159_v22 = vsub.s32 0, %v1153_v20  ;;  %v258_v23 = vsub.s32 1, %v1153_v20  ;;  %v905_v46 = vld [vmem:[%s1324_s10] ss:$0 sm:$0xff] }
   0x6   :  { %936 = vmatpush3.bf16.xpose.msra.mxu1 %v53_v7  ;;  %932 = vmatmul.mubr.msk.bf16.vlgmr.msra.gmra.mxu0 %vm51_vm2, %v50_v5  ;;  %v165_v26 = vsel %vm43_vm3, 65537, %v1056_v25  ;;  %v166_v30 = vsel %vm44_vm4, 65537, %v1056_v25 }
   0x7   :  { %947 = vmatprep.subr.bf16.mxu1 %v1052_v0  ;;  %943 = vmatprep.mubr.msk.bf16.mxu0 %vm1053_vm1, %v1052_v0  ;;  %v167_v29 = vunpack.c.l.b16 %v165_v26  ;;  %v168_v36 = vunpack.c.l.b16 %v166_v30 }
   0x9   :  { %vm1168_vm5 = vcmp.ne.s32.totalorder %v167_v29, 0  ;;  %vm1174_vm9 = vcmp.ne.s32.totalorder %v168_v36, 0 }
   0xd   :  { %938 = vmatmul.mubr.msk.bf16.vlgmr.msra.gmra.mxu1 %vm51_vm2, %v48_v9 }
   0xe   :  { %949 = vmatprep.mubr.msk.bf16.mxu1 %vm1053_vm1, %v1052_v0 }
  0xc6   :  { %v93_v10 = vpop.f32.mrf.mxu0 }
  0xc7   :  { %145 = vperm.xlu1 %1004, %v93_v10   ;;  %249 = vperm.xlu0 %1003, %v93_v10  }
  0xc8   :  { %v933_v11 = vpop.f32.mrf.mxu0 }
  0xca   :  { %v96_v12 = vpop.f32.mrf.mxu0 }
  0xcb   :  { %v1148_v13 = vpack.c.bf16 %v96_v12, %v93_v10  ;;  %150 = vperm.xlu1 %1004, %v96_v12   ;;  %253 = vperm.xlu0 %1003, %v96_v12  }
  0xcc   :  { %v934_v14 = vpop.f32.mrf.mxu0 }
  0xcd   :  { %v137_v15 = vpop.f32.mrf.mxu1  ;;  %942 = vmatpush3.bf16.msra.mxu0 %v1148_v13 }
  0xce   :  { %953 = vmatprep.subr.bf16.mxu0 %v1052_v0  ;;  %v156_v27 = vrot.slane %v137_v15, %v1159_v22  ;;  %v259_v28 = vrot.slane %v137_v15, %v258_v23 }
  0xcf   :  { %v939_v16 = vpop.f32.mrf.mxu1  ;;  %1005 = vset.pattern.permute.xlu1 %v1054_v6  ;;  %1007 = vset.pattern.permute.xlu0 %v1055_v8 }
  0xd1   :  { %v140_v17 = vpop.f32.mrf.mxu1 }
  0xd3   :  { %v940_v18 = vpop.f32.mrf.mxu1 }
 0x142   :  { %v146_v31 = vpop.permute.xlu1 %145  ;;  %v250_v32 = vpop.permute.xlu0 %249 }
 0x143   :  { %v157_v33 = vadd.f32 %v156_v27, %v146_v31  ;;  %v260_v34 = vadd.f32 %v259_v28, %v250_v32 }
 0x145   :  { %v161_v37 = vmul.f32 0.2, %v157_v33  ;;  %v264_v38 = vmul.f32 0.2, %v260_v34  ;;  %vm262_vm6 = vcmp.gt.f32.partialorder %v260_v34, 0.0  ;;  %vm159_vm7 = vcmp.gt.f32.partialorder %v157_v33, 0.0 }
 0x146   :  { %v151_v39 = vpop.permute.xlu1 %150  ;;  %v254_v40 = vpop.permute.xlu0 %253 }
 0x147   :  { %v158_v41 = vadd.f32 %v156_v27, %v151_v39  ;;  %v261_v42 = vadd.f32 %v259_v28, %v254_v40  ;;  %v266_v43 = vsel %vm262_vm6, %v260_v34, %v264_v38  ;;  %v163_v44 = vsel %vm159_vm7, %v157_v33, %v161_v37 }
 0x148   :  { %v268_v45 = vsel %vm1168_vm5, %v266_v43, -1e+30  ;;  %v171_v50 = vsel %vm1168_vm5, %v163_v44, -1e+30  ;;  %v1010_v43 = vld [vmem:[%s1318_s5] sm:$0xff]  }
 0x149   :  { %v162_v47 = vmul.f32 0.2, %v158_v41  ;;  %v265_v48 = vmul.f32 0.2, %v261_v42  ;;  %v270_v49 = vsel %vm173_vm8, %v268_v45, -inf  ;;  %vm263_vm10 = vcmp.gt.f32.partialorder %v261_v42, 0.0 }
 0x14a   :  { %271 = vmax.xlane.f32.xlu0 %v270_v49  ;;  %vm160_vm11 = vcmp.gt.f32.partialorder %v158_v41, 0.0  ;;  %v174_v55 = vsel %vm173_vm8, %v171_v50, -inf }
 0x14b   :  { %v267_v51 = vsel %vm263_vm10, %v261_v42, %v265_v48  ;;  %v164_v52 = vsel %vm160_vm11, %v158_v41, %v162_v47 }
 0x14c   :  { %v269_v53 = vsel %vm1174_vm9, %v267_v51, -1e+30  ;;  %v172_v56 = vsel %vm1174_vm9, %v164_v52, -1e+30 }
 0x14d   :  { %v273_v54 = vsel %vm173_vm8, %v269_v53, -inf  ;;  %v177_v57 = vsel %vm173_vm8, %v172_v56, -inf }
 0x14e   :  { %274 = vmax.xlane.f32.xlu1 %v273_v54  ;;  %175 = vmax.xlane.f32.xlu0 %v174_v55  ;;  %v895_v54 = vld [vmem:[%s1319_s4] ss:$0 sm:$0xff] }
 0x152   :  { %178 = vmax.xlane.f32.xlu0 %v177_v57 }
 0x1d3   :  { %v272_v58 = vpop.xlane.xlu0 %271 }
 0x1d4   :  { %v276_v59 = vsub.f32 %v268_v45, %v272_v58 }
 0x1d6   :  { %v278_v60 = vmul.f32 1.442695, %v276_v59 }
 0x1d7   :  { %v275_v61 = vpop.xlane.xlu1 %274  ;;  %v176_v62 = vpop.xlane.xlu0 %175 }
 0x1d8   :  { %1012 = vpow2.f32 %v278_v60  ;;  %v277_v63 = vsub.f32 %v269_v53, %v275_v61  ;;  %v180_v1 = vsub.f32 %v171_v50, %v176_v62 }
 0x1da   :  { %v280_v2 = vmul.f32 1.442695, %v277_v63  ;;  %v182_v3 = vmul.f32 1.442695, %v180_v1  ;;  %v369_v1 = vld [vmem:[%s1320_s6] sm:$0x1] }
 0x1db   :  { %v179_v4 = vpop.xlane.xlu0 %178 }
 0x1dc   :  { %1014 = vpow2.f32 %v280_v2  ;;  %v181_v5 = vsub.f32 %v172_v56, %v179_v4 }
 0x1dd   :  { %1016 = vpow2.f32 %v182_v3 }
 0x1de   :  { %v184_v6 = vmul.f32 1.442695, %v181_v5 }
 0x1e0   :  { %1018 = vpow2.f32 %v184_v6 }
 0x1e5   :  { %v1013_v7 = vpop.eup %1012 }
 0x1e6   :  { %v282_v9 = vsel %vm1168_vm5, %v1013_v7, 0.0 }
 0x1e7   :  { %v284_v10 = vsel %vm173_vm8, %v282_v9, 0.0 }
 0x1e8   :  { %285 = vadd.xlane.f32.xlu1 %v284_v10 }
 0x1e9   :  { %v1015_v11 = vpop.eup %1014 }
 0x1ea   :  { %v1017_v12 = vpop.eup %1016  ;;  %v283_v14 = vsel %vm1174_vm9, %v1015_v11, 0.0 }
 0x1eb   :  { %v287_v15 = vsel %vm173_vm8, %v283_v14, 0.0  ;;  %v186_v16 = vsel %vm1168_vm5, %v1017_v12, 0.0 }
 0x1ec   :  { %288 = vadd.xlane.f32.xlu0 %v287_v15  ;;  %v188_v18 = vsel %vm173_vm8, %v186_v16, 0.0 }
 0x1ed   :  { %v1019_v17 = vpop.eup %1018 }
 0x1ee   :  { %v187_v19 = vsel %vm1174_vm9, %v1019_v17, 0.0 }
 0x1ef   :  { %v191_v21 = vsel %vm173_vm8, %v187_v19, 0.0 }
 0x1f0   :  { %189 = vadd.xlane.f32.xlu0 %v188_v18 }
 0x1f4   :  { %192 = vadd.xlane.f32.xlu0 %v191_v21 }
 0x1f9   :  { %300 = vrot.lane.b32.xlu1 %v1148_v13, %s1057_s0 }
 0x271   :  { %v286_v24 = vpop.xlane.xlu1 %285 }
 0x272   :  { %vm290_vm12 = vcmp.gt.f32.partialorder %v286_v24, 0.0 }
 0x273   :  { %v292_v25 = vsel %vm290_vm12, %v286_v24, 1.0 }
 0x274   :  { %1020 = vrcp.f32 %v292_v25 }
 0x275   :  { %v301_v26 = vpop.permute.xlu1 %300  ;;  %v289_v27 = vpop.xlane.xlu0 %288 }
 0x276   :  { %vm291_vm13 = vcmp.gt.f32.partialorder %v289_v27, 0.0  ;;  %948 = vmatpush3.bf16.msra.mxu1 %v301_v26 }
 0x277   :  { %v293_v28 = vsel %vm291_vm13, %v289_v27, 1.0  ;;  %959 = vmatprep.subr.bf16.mxu1 %v1052_v0 }
 0x278   :  { %1022 = vrcp.f32 %v293_v28 }
 0x279   :  { %v190_v29 = vpop.xlane.xlu0 %189 }
 0x27a   :  { %vm194_vm14 = vcmp.gt.f32.partialorder %v190_v29, 0.0 }
 0x27b   :  { %v196_v30 = vsel %vm194_vm14, %v190_v29, 1.0 }
 0x27c   :  { %1024 = vrcp.f32 %v196_v30 }
 0x27d   :  { %v193_v31 = vpop.xlane.xlu0 %192 }
 0x27e   :  { %vm195_vm15 = vcmp.gt.f32.partialorder %v193_v31, 0.0 }
 0x27f   :  { %v197_v32 = vsel %vm195_vm15, %v193_v31, 1.0 }
 0x280   :  { %1026 = vrcp.f32 %v197_v32 }
 0x281   :  { %v1021_v13 = vpop.eup %1020 }
 0x282   :  { %v296_v34 = vmul.f32 %v1021_v13, %v282_v9 }
 0x285   :  { %v1023_v33 = vpop.eup %1022 }
 0x286   :  { %v297_v36 = vmul.f32 %v1023_v33, %v283_v14 }
 0x288   :  { %v298_v37 = vpack.c.bf16 %v297_v36, %v296_v34 }
 0x289   :  { %v1025_v38 = vpop.eup %1024 }
 0x28a   :  { %950 = vmatmul.mubr.msk.bf16.vlgmr.msra.gmra.mxu1 %vm173_vm8, %v298_v37  ;;  %v200_v40 = vmul.f32 %v1025_v38, %v186_v16 }
 0x28b   :  { %961 = vmatprep.mubr.msk.bf16.mxu1 %vm1053_vm1, %v1052_v0 }
 0x28d   :  { %v1027_v39 = vpop.eup %1026 }
 0x28e   :  { %v201_v41 = vmul.f32 %v1027_v39, %v187_v19 }
 0x290   :  { %v202_v42 = vpack.c.bf16 %v201_v41, %v200_v40 }
 0x292   :  { %944 = vmatmul.mubr.msk.bf16.vlgmr.msra.gmra.mxu0 %vm173_vm8, %v202_v42 }
 0x293   :  { %955 = vmatprep.mubr.msk.bf16.mxu0 %vm1053_vm1, %v1052_v0  ;;  %954 = vmatpush3.bf16.msra.mxu0 %v1010_v43 }
 0x294   :  { %965 = vmatprep.subr.bf16.mxu0 %v1052_v0 }
 0x34a   :  { %v340_v44 = vpop.f32.mrf.mxu1 }
 0x34b   :  { %349 = vrot.lane.b32.xlu0 %v340_v44, %s1058_s28 }
 0x34c   :  { %v951_v45 = vpop.f32.mrf.mxu1 }
 0x34e   :  { %v343_v47 = vpop.f32.mrf.mxu1 }
 0x34f   :  { %351 = vrot.lane.b32.xlu1 %v343_v47, %s1058_s28 }
 0x350   :  { %v952_v48 = vpop.f32.mrf.mxu1 }
 0x352   :  { %v241_v49 = vpop.f32.mrf.mxu0 }
 0x354   :  { %v945_v50 = vpop.f32.mrf.mxu0 }
 0x356   :  { %v244_v51 = vpop.f32.mrf.mxu0 }
 0x358   :  { %v946_v52 = vpop.f32.mrf.mxu0 }
 0x3bd   :  { %v350_v53 = vpop.permute.xlu0 %349 }
 0x3be   :  { %v355_v55 = vsel %vm51_vm2, %v241_v49, %v350_v53 }
 0x3bf   :  { %v363_v56 = vadd.f32 %v895_v54, %v355_v55 }
 0x3c1   :  { %v352_v57 = vpop.permute.xlu1 %351  ;;  %v365_v60 = vmax.f32 %v363_v56, 0.0 }
 0x3c2   :  { %v356_v58 = vsel %vm51_vm2, %v244_v51, %v352_v57 }
 0x3c3   :  { %v364_v59 = vadd.f32 %v895_v54, %v356_v58 }
 0x3c5   :  { %v366_v61 = vmax.f32 %v364_v59, 0.0 }
 0x3c7   :  { %v371_v62 = vpack.c.bf16 %v366_v61, %v365_v60 }
 0x3c9   :  { %956 = vmatmul.mubr.msk.bf16.vlgmr.msra.gmra.mxu0 %vm173_vm8, %v371_v62  ;;  %v379_v63 = vsel %vm173_vm8, %v371_v62, 0 }
 0x3ca   :  { %960 = vmatpush3.bf16.xpose.msra.mxu1 %v379_v63  ;;  %967 = vmatprep.mubr.msk.bf16.mxu0 %vm1053_vm1, %v1052_v0 }
 0x3cb   :  { %971 = vmatprep.subr.bf16.mxu1 %v1052_v0 }
 0x3d1   :  { %962 = vmatmul.mubr.msk.bf16.vlgmr.msra.gmra.mxu1 %vm173_vm8, %v369_v1 }
 0x3d2   :  { %973 = vmatprep.mubr.msk.bf16.mxu1 %vm1053_vm1, %v1052_v0 }
 0x489   :  { %v415_v2 = vpop.f32.mrf.mxu0 }
 0x48a   :  { %564 = vperm.xlu1 %1005, %v415_v2  }
 0x48b   :  { %v957_v3 = vpop.f32.mrf.mxu0 }
 0x48d   :  { %v418_v4 = vpop.f32.mrf.mxu0 }
 0x48e   :  { %v1231_v5 = vpack.c.bf16 %v418_v4, %v415_v2  ;;  %472 = vperm.xlu0 %1007, %v418_v4   ;;  %568 = vperm.xlu1 %1005, %v418_v4  }
 0x48f   :  { %v958_v6 = vpop.f32.mrf.mxu0 }
 0x490   :  { %966 = vmatpush3.bf16.msra.mxu0 %v1231_v5 }
 0x491   :  { %v459_v7 = vpop.f32.mrf.mxu1  ;;  %977 = vmatprep.subr.bf16.mxu0 %v1052_v0 }
 0x492   :  { %1006 = vset.pattern.permute.xlu1 %v1055_v8  ;;  %v574_v12 = vrot.slane %v459_v7, %v258_v23  ;;  %v478_v15 = vrot.slane %v459_v7, %v1159_v22 }
 0x493   :  { %467 = vperm.xlu1 %1006, %v415_v2   ;;  %v963_v9 = vpop.f32.mrf.mxu1 }
 0x495   :  { %v462_v10 = vpop.f32.mrf.mxu1 }
 0x497   :  { %v964_v11 = vpop.f32.mrf.mxu1 }
 0x505   :  { %v565_v14 = vpop.permute.xlu1 %564 }
 0x506   :  { %v575_v16 = vadd.f32 %v574_v12, %v565_v14 }
 0x508   :  { %v579_v17 = vmul.f32 0.2, %v575_v16  ;;  %vm577_vm0 = vcmp.gt.f32.partialorder %v575_v16, 0.0 }
 0x509   :  { %v473_v18 = vpop.permute.xlu0 %472  ;;  %v569_v19 = vpop.permute.xlu1 %568 }
 0x50a   :  { %v480_v21 = vadd.f32 %v478_v15, %v473_v18  ;;  %v576_v24 = vadd.f32 %v574_v12, %v569_v19  ;;  %v581_v25 = vsel %vm577_vm0, %v575_v16, %v579_v17 }
 0x50b   :  { %v583_v8 = vsel %vm1168_vm5, %v581_v25, -1e+30  ;;  %v1011_v25 = vld [vmem:[%s1321_s8] sm:$0xff]  }
 0x50c   :  { %v484_v26 = vmul.f32 0.2, %v480_v21  ;;  %v580_v27 = vmul.f32 0.2, %v576_v24  ;;  %v585_v28 = vsel %vm173_vm8, %v583_v8, -inf  ;;  %vm578_vm3 = vcmp.gt.f32.partialorder %v576_v24, 0.0 }
 0x50d   :  { %586 = vmax.xlane.f32.xlu1 %v585_v28  ;;  %vm482_vm4 = vcmp.gt.f32.partialorder %v480_v21, 0.0 }
 0x50e   :  { %v468_v20 = vpop.permute.xlu1 %467  ;;  %v582_v23 = vsel %vm578_vm3, %v576_v24, %v580_v27  ;;  %v486_v29 = vsel %vm482_vm4, %v480_v21, %v484_v26 }
 0x50f   :  { %v479_v30 = vadd.f32 %v478_v15, %v468_v20  ;;  %v584_v31 = vsel %vm1174_vm9, %v582_v23, -1e+30  ;;  %v488_v33 = vsel %vm1174_vm9, %v486_v29, -1e+30  ;;  %v1059_v20 = vmov 4  }
 0x510   :  { %v588_v32 = vsel %vm173_vm8, %v584_v31, -inf  ;;  %v492_v36 = vsel %vm173_vm8, %v488_v33, -inf  ;;  %1008 = vset.pattern.permute.xlu1 %v1059_v20  ;;  %1009 = vset.pattern.permute.xlu0 %v1059_v20 }
 0x511   :  { %v483_v13 = vmul.f32 0.2, %v479_v30  ;;  %589 = vmax.xlane.f32.xlu0 %v588_v32  ;;  %vm481_vm6 = vcmp.gt.f32.partialorder %v479_v30, 0.0 }
 0x513   :  { %v485_v34 = vsel %vm481_vm6, %v479_v30, %v483_v13  ;;  %v901_v13 = vld [vmem:[%s1322_s7] ss:$0 sm:$0xff] }
 0x514   :  { %v487_v37 = vsel %vm1168_vm5, %v485_v34, -1e+30 }
 0x515   :  { %493 = vmax.xlane.f32.xlu0 %v492_v36  ;;  %v489_v38 = vsel %vm173_vm8, %v487_v37, -inf }
 0x516   :  { %490 = vmax.xlane.f32.xlu1 %v489_v38 }
 0x596   :  { %v587_v39 = vpop.xlane.xlu1 %586 }
 0x597   :  { %v591_v40 = vsub.f32 %v583_v8, %v587_v39 }
 0x599   :  { %v593_v41 = vmul.f32 1.442695, %v591_v40 }
 0x59a   :  { %v590_v42 = vpop.xlane.xlu0 %589 }
 0x59b   :  { %1028 = vpow2.f32 %v593_v41  ;;  %v592_v43 = vsub.f32 %v584_v31, %v590_v42 }
 0x59d   :  { %v595_v44 = vmul.f32 1.442695, %v592_v43  ;;  %v684_v43 = vld [vmem:[%s1323_s9] sm:$0x1] }
 0x59e   :  { %v494_v45 = vpop.xlane.xlu0 %493 }
 0x59f   :  { %1030 = vpow2.f32 %v595_v44  ;;  %v496_v47 = vsub.f32 %v488_v33, %v494_v45  ;;  %v491_v48 = vpop.xlane.xlu1 %490 }
 0x5a0   :  { %v495_v49 = vsub.f32 %v487_v37, %v491_v48 }
 0x5a1   :  { %v499_v50 = vmul.f32 1.442695, %v496_v47 }
 0x5a2   :  { %v497_v51 = vmul.f32 1.442695, %v495_v49 }
 0x5a3   :  { %1032 = vpow2.f32 %v499_v50 }
 0x5a4   :  { %1034 = vpow2.f32 %v497_v51 }
 0x5a8   :  { %v1029_v52 = vpop.eup %1028 }
 0x5a9   :  { %v597_v53 = vsel %vm1168_vm5, %v1029_v52, 0.0 }
 0x5aa   :  { %v599_v54 = vsel %vm173_vm8, %v597_v53, 0.0 }
 0x5ab   :  { %600 = vadd.xlane.f32.xlu1 %v599_v54 }
 0x5ac   :  { %v1031_v55 = vpop.eup %1030 }
 0x5ad   :  { %v598_v56 = vsel %vm1174_vm9, %v1031_v55, 0.0 }
 0x5ae   :  { %v602_v57 = vsel %vm173_vm8, %v598_v56, 0.0 }
 0x5af   :  { %603 = vadd.xlane.f32.xlu0 %v602_v57 }
 0x5b0   :  { %v1033_v58 = vpop.eup %1032 }
 0x5b1   :  { %v1035_v59 = vpop.eup %1034  ;;  %v502_v62 = vsel %vm1174_vm9, %v1033_v58, 0.0 }
 0x5b2   :  { %v501_v60 = vsel %vm1168_vm5, %v1035_v59, 0.0  ;;  %v506_v63 = vsel %vm173_vm8, %v502_v62, 0.0 }
 0x5b3   :  { %v503_v61 = vsel %vm173_vm8, %v501_v60, 0.0 }
 0x5b4   :  { %504 = vadd.xlane.f32.xlu0 %v503_v61 }
 0x5b8   :  { %507 = vadd.xlane.f32.xlu0 %v506_v63 }
 0x5bc   :  { %615 = vrot.lane.b32.xlu1 %v1231_v5, %s1057_s0 }
 0x634   :  { %v601_v1 = vpop.xlane.xlu1 %600 }
 0x635   :  { %vm605_vm7 = vcmp.gt.f32.partialorder %v601_v1, 0.0 }
 0x636   :  { %v607_v2 = vsel %vm605_vm7, %v601_v1, 1.0 }
 0x637   :  { %1036 = vrcp.f32 %v607_v2 }
 0x638   :  { %v604_v3 = vpop.xlane.xlu0 %603  ;;  %v616_v4 = vpop.permute.xlu1 %615 }
 0x639   :  { %vm606_vm10 = vcmp.gt.f32.partialorder %v604_v3, 0.0  ;;  %972 = vmatpush3.bf16.msra.mxu1 %v616_v4 }
 0x63a   :  { %v608_v6 = vsel %vm606_vm10, %v604_v3, 1.0  ;;  %983 = vmatprep.subr.bf16.mxu1 %v1052_v0 }
 0x63b   :  { %1038 = vrcp.f32 %v608_v6 }
 0x63d   :  { %v505_v7 = vpop.xlane.xlu0 %504 }
 0x63e   :  { %vm509_vm11 = vcmp.gt.f32.partialorder %v505_v7, 0.0 }
 0x63f   :  { %v511_v9 = vsel %vm509_vm11, %v505_v7, 1.0 }
 0x640   :  { %1040 = vrcp.f32 %v511_v9 }
 0x641   :  { %v508_v10 = vpop.xlane.xlu0 %507 }
 0x642   :  { %vm510_vm12 = vcmp.gt.f32.partialorder %v508_v10, 0.0 }
 0x643   :  { %v512_v11 = vsel %vm510_vm12, %v508_v10, 1.0 }
 0x644   :  { %1042 = vrcp.f32 %v512_v11  ;;  %v1037_v5 = vpop.eup %1036 }
 0x645   :  { %v611_v14 = vmul.f32 %v1037_v5, %v597_v53 }
 0x648   :  { %v1039_v12 = vpop.eup %1038 }
 0x649   :  { %v612_v15 = vmul.f32 %v1039_v12, %v598_v56 }
 0x64b   :  { %v613_v16 = vpack.c.bf16 %v612_v15, %v611_v14 }
 0x64d   :  { %974 = vmatmul.mubr.msk.bf16.vlgmr.msra.gmra.mxu1 %vm173_vm8, %v613_v16  ;;  %v1041_v17 = vpop.eup %1040 }
 0x64e   :  { %985 = vmatprep.mubr.msk.bf16.mxu1 %vm1053_vm1, %v1052_v0  ;;  %v515_v19 = vmul.f32 %v1041_v17, %v501_v60 }
 0x651   :  { %v1043_v18 = vpop.eup %1042 }
 0x652   :  { %v516_v21 = vmul.f32 %v1043_v18, %v502_v62 }
 0x654   :  { %v517_v24 = vpack.c.bf16 %v516_v21, %v515_v19 }
 0x656   :  { %968 = vmatmul.mubr.msk.bf16.vlgmr.msra.gmra.mxu0 %vm173_vm8, %v517_v24 }
 0x657   :  { %979 = vmatprep.mubr.msk.bf16.mxu0 %vm1053_vm1, %v1052_v0  ;;  %978 = vmatpush3.bf16.msra.mxu0 %v1011_v25 }
 0x658   :  { %989 = vmatprep.subr.bf16.mxu0 %v1052_v0 }
 0x70d   :  { %v655_v8 = vpop.f32.mrf.mxu1 }
 0x70e   :  { %664 = vrot.lane.b32.xlu0 %v655_v8, %s1058_s28 }
 0x70f   :  { %v975_v26 = vpop.f32.mrf.mxu1 }
 0x711   :  { %v658_v27 = vpop.f32.mrf.mxu1 }
 0x712   :  { %666 = vrot.lane.b32.xlu1 %v658_v27, %s1058_s28 }
 0x713   :  { %v976_v28 = vpop.f32.mrf.mxu1 }
 0x716   :  { %v556_v23 = vpop.f32.mrf.mxu0 }
 0x718   :  { %v969_v29 = vpop.f32.mrf.mxu0 }
 0x71a   :  { %v559_v30 = vpop.f32.mrf.mxu0 }
 0x71c   :  { %v970_v31 = vpop.f32.mrf.mxu0 }
 0x780   :  { %v665_v32 = vpop.permute.xlu0 %664 }
 0x781   :  { %v670_v33 = vsel %vm51_vm2, %v556_v23, %v665_v32 }
 0x782   :  { %v678_v34 = vadd.f32 %v901_v13, %v670_v33 }
 0x784   :  { %v667_v36 = vpop.permute.xlu1 %666  ;;  %v680_v39 = vmax.f32 %v678_v34, 0.0 }
 0x785   :  { %v671_v37 = vsel %vm51_vm2, %v559_v30, %v667_v36 }
 0x786   :  { %v679_v38 = vadd.f32 %v901_v13, %v671_v37 }
 0x788   :  { %v681_v40 = vmax.f32 %v679_v38, 0.0 }
 0x78a   :  { %v686_v41 = vpack.c.bf16 %v681_v40, %v680_v39 }
 0x78c   :  { %980 = vmatmul.mubr.msk.bf16.vlgmr.msra.gmra.mxu0 %vm173_vm8, %v686_v41  ;;  %v694_v42 = vsel %vm173_vm8, %v686_v41, 0 }
 0x78d   :  { %984 = vmatpush3.bf16.xpose.msra.mxu1 %v694_v42  ;;  %991 = vmatprep.mubr.msk.bf16.mxu0 %vm1053_vm1, %v1052_v0 }
 0x794   :  { %986 = vmatmul.mubr.msk.bf16.vlgmr.msra.gmra.mxu1 %vm173_vm8, %v684_v43 }
 0x84c   :  { %v730_v44 = vpop.f32.mrf.mxu0 }
 0x84d   :  { %782 = vperm.xlu1 %1008, %v730_v44  }
 0x84e   :  { %v981_v45 = vpop.f32.mrf.mxu0 }
 0x850   :  { %v733_v47 = vpop.f32.mrf.mxu0 }
 0x851   :  { %v833_v48 = vpack.c.bf16 %v733_v47, %v730_v44  ;;  %787 = vperm.xlu1 %1008, %v733_v47  }
 0x852   :  { %v982_v49 = vpop.f32.mrf.mxu0 }
 0x853   :  { %990 = vmatpush3.bf16.msra.mxu0 %v833_v48 }
 0x854   :  { %v774_v50 = vpop.f32.mrf.mxu1 }
 0x855   :  { %v793_v0 = vrot.slane %v774_v50, %v1159_v22 }
 0x856   :  { %v987_v51 = vpop.f32.mrf.mxu1 }
 0x858   :  { %v777_v52 = vpop.f32.mrf.mxu1 }
 0x85a   :  { %v988_v53 = vpop.f32.mrf.mxu1 }
 0x8c8   :  { %v783_v54 = vpop.permute.xlu1 %782 }
 0x8c9   :  { %v794_v55 = vadd.f32 %v793_v0, %v783_v54 }
 0x8cb   :  { %v798_v56 = vmul.f32 0.2, %v794_v55  ;;  %vm796_vm1 = vcmp.gt.f32.partialorder %v794_v55, 0.0 }
 0x8cc   :  { %v788_v57 = vpop.permute.xlu1 %787 }
 0x8cd   :  { %v795_v58 = vadd.f32 %v793_v0, %v788_v57  ;;  %v800_v59 = vsel %vm796_vm1, %v794_v55, %v798_v56 }
 0x8ce   :  { %v802_v60 = vsel %vm1168_vm5, %v800_v59, -1e+30 }
 0x8cf   :  { %v799_v61 = vmul.f32 0.2, %v795_v58  ;;  %v804_v62 = vsel %vm173_vm8, %v802_v60, -inf  ;;  %vm797_vm2 = vcmp.gt.f32.partialorder %v795_v58, 0.0 }
 0x8d0   :  { %805 = vmax.xlane.f32.xlu1 %v804_v62 }
 0x8d1   :  { %v801_v63 = vsel %vm797_vm2, %v795_v58, %v799_v61 }
 0x8d2   :  { %v803_v1 = vsel %vm1174_vm9, %v801_v63, -1e+30 }
 0x8d3   :  { %v807_v22 = vsel %vm173_vm8, %v803_v1, -inf }
 0x8d4   :  { %808 = vmax.xlane.f32.xlu0 %v807_v22 }
 0x959   :  { %v806_v2 = vpop.xlane.xlu1 %805 }
 0x95a   :  { %v810_v3 = vsub.f32 %v802_v60, %v806_v2 }
 0x95c   :  { %v812_v4 = vmul.f32 1.442695, %v810_v3 }
 0x95d   :  { %v809_v6 = vpop.xlane.xlu0 %808 }
 0x95e   :  { %1044 = vpow2.f32 %v812_v4  ;;  %v811_v7 = vsub.f32 %v803_v1, %v809_v6 }
 0x960   :  { %v814_v9 = vmul.f32 1.442695, %v811_v7 }
 0x962   :  { %1046 = vpow2.f32 %v814_v9 }
 0x96b   :  { %v1045_v10 = vpop.eup %1044 }
 0x96c   :  { %v816_v11 = vsel %vm1168_vm5, %v1045_v10, 0.0  ;;  %vm884_vm5 = vcmask 31744  }
 0x96d   :  { %v818_v5 = vsel %vm173_vm8, %v816_v11, 0.0 }
 0x96e   :  { %819 = vadd.xlane.f32.xlu0 %v818_v5 }
 0x96f   :  { %v1047_v12 = vpop.eup %1046 }
 0x970   :  { %v817_v14 = vsel %vm1174_vm9, %v1047_v12, 0.0 }
 0x971   :  { %v821_v15 = vsel %vm173_vm8, %v817_v14, 0.0 }
 0x972   :  { %822 = vadd.xlane.f32.xlu1 %v821_v15 }
 0x9f7   :  { %v820_v16 = vpop.xlane.xlu0 %819 }
 0x9f8   :  { %vm824_vm13 = vcmp.gt.f32.partialorder %v820_v16, 0.0 }
 0x9f9   :  { %v826_v17 = vsel %vm824_vm13, %v820_v16, 1.0 }
 0x9fa   :  { %1048 = vrcp.f32 %v826_v17 }
 0x9fb   :  { %v823_v18 = vpop.xlane.xlu1 %822 }
 0x9fc   :  { %vm825_vm14 = vcmp.gt.f32.partialorder %v823_v18, 0.0 }
 0x9fd   :  { %v827_v19 = vsel %vm825_vm14, %v823_v18, 1.0 }
 0x9fe   :  { %1050 = vrcp.f32 %v827_v19 }
 0xa07   :  { %v1049_v35 = vpop.eup %1048 }
 0xa08   :  { %v830_v24 = vmul.f32 %v1049_v35, %v816_v11 }
 0xa0b   :  { %v1051_v21 = vpop.eup %1050 }
 0xa0c   :  { %v831_v25 = vmul.f32 %v1051_v21, %v817_v14 }
 0xa0e   :  { %v832_v8 = vpack.c.bf16 %v831_v25, %v830_v24 }
 0xa10   :  { %992 = vmatmul.mubr.msk.bf16.vlgmr.msra.gmra.mxu0 %vm173_vm8, %v832_v8 }
 0xad0   :  { %v877_v26 = vpop.f32.mrf.mxu0 }
 0xad1   :  { %v878_v27 = vadd.f32 %v905_v46, %v877_v26 }
 0xad2   :  { %v993_v28 = vpop.f32.mrf.mxu0 }
 0xad3   :  { %885 = vst.msk [vmem:[%s1325_s11] sm:$0xff] %vm884_vm5, %v878_v27 }
 0xad4   :  { %v880_v20 = vpop.f32.mrf.mxu0 }
 0xad5   :  { %v881_v23 = vadd.f32 %v905_v46, %v880_v20 }
 0xad6   :  { %v994_v29 = vpop.f32.mrf.mxu0 }
 0xad7   :  { %886 = vst.msk [vmem:[%s1325_s11 + $0x8] sm:$0xff] %vm884_vm5, %v881_v23 }

</bundles_post_ra>
